<compile_context>
chip_gen: v7x
topology: tpu7x:2x2x1
jax: 0.10.0
libtpu: 0.0.40
codegen_flags: <defaults>
</compile_context>

<pallas_src>
import jax
import jax.numpy as jnp
from jax import lax
from jax.experimental import pallas as pl
from jax.experimental.pallas import tpu as pltpu

_LANE = 128
_SUBLANE = 8

# Conservative budgets so one config fits v7x (64 MiB VMEM) and v5e/v6e (128 MiB).
_RESIDENT_TABLE_MAX_BYTES = 16 * 1024 * 1024     # resident-table fast path cutoff
_TILE_BUFFERS_BUDGET_BYTES = 12 * 1024 * 1024    # 2x pe + 2x out double buffers
_VMEM_LIMIT_CAP_BYTES = 56 * 1024 * 1024


def _round_up(x, m):
    return (x + m - 1) // m * m


def _make_resident_kernel(scale, tile_s, unroll):
    """Fast path: embedding table resident in VMEM, gather via dynamic row reads."""

    def kernel(ids_ref, table_ref, pe_ref, out_ref):
        # ids_ref : SMEM (B*S_pad,) int32 (scalar prefetch)
        # table_ref: VMEM (V, Dp) resident across the whole grid
        # pe_ref  : VMEM (tile_s, Dp) positional rows for this tile
        # out_ref : VMEM (tile_s, Dp)
        base = (pl.program_id(0) * pl.num_programs(1) + pl.program_id(1)) * tile_s

        def gather(t, carry):
            tok = ids_ref[base + t]
            out_ref[pl.ds(t, 1), :] = table_ref[pl.ds(tok, 1), :]
            return carry

        lax.fori_loop(0, tile_s, gather, 0, unroll=unroll)

        # Fused scale (sqrt(d_model)) + positional add in one vectorized pass.
        out_ref[...] = (out_ref[...] * scale + pe_ref[...]).astype(out_ref.dtype)

    return kernel


def _make_hbm_gather_kernel(scale, tile_s, depth):
    """Fallback: table in HBM, row-DMA gather pipelined `depth` deep into out_ref."""

    def kernel(ids_ref, table_hbm, pe_ref, out_ref, sems):
        base = (pl.program_id(0) * pl.num_programs(1) + pl.program_id(1)) * tile_s

        def issue(t, tok):
            pltpu.make_async_copy(
                table_hbm.at[pl.ds(tok, 1)],
                out_ref.at[pl.ds(t, 1)],
                sems.at[t % depth],
            ).start()

        def wait(t, tok):
            # Same (tok, t) as the matching issue() -> descriptor provably
            # identical to the one that was started.
            pltpu.make_async_copy(
                table_hbm.at[pl.ds(tok, 1)],
                out_ref.at[pl.ds(t, 1)],
                sems.at[t % depth],
            ).wait()

        # Prologue: fill the DMA pipeline.
        for t in range(depth):
            issue(t, ids_ref[base + t])

        main_iters = tile_s - depth

        # Steady state: no per-iteration guard; always wait(t), issue(t+depth).
        def steady(t, carry):
            tok_cur = ids_ref[base + t]
            # Hoist the next token's SMEM read above the wait (a DMA wait
            # breaks SMEM sst->sld forwarding).
            tok_next = ids_ref[base + t + depth]
            wait(t, tok_cur)
            issue(t + depth, tok_next)
            return carry

        if main_iters > 0:
            lax.fori_loop(0, main_iters, steady, 0, unroll=min(8, main_iters))

        # Drain the last `depth` outstanding copies.
        def drain(t, carry):
            wait(t, ids_ref[base + t])
            return carry

        lax.fori_loop(main_iters, tile_s, drain, 0, unroll=min(8, depth))

        # Fused scale (sqrt(d_model)) + positional add in one vectorized pass.
        out_ref[...] = (out_ref[...] * scale + pe_ref[...]).astype(out_ref.dtype)

    return kernel


def make_transformer_embedding_params(table, pe, d_model):
    """Init-time prep: pad the feature axis to a lane multiple exactly once."""
    Dp = _round_up(d_model, _LANE)
    pad = Dp - d_model
    if pad:
        table = jnp.pad(table, ((0, 0), (0, pad)))
        pe = jnp.pad(pe, ((0, 0), (0, pad)))
    return {"table": table, "pe": pe, "d_model": d_model}


def transformer_embedding_forward(params, x, *, tile_s=256, dma_depth=16,
                                  force_hbm_gather=False):
    """x: (B, S) int ids -> (B, S, d_model) f32."""
    table_p = params["table"]      # (V, Dp), lane-padded at init
    pe_p = params["pe"]            # (max_len, Dp)
    d_model = params["d_model"]

    B, S = x.shape
    V, Dp = table_p.shape
    scale = float(d_model) ** 0.5

    # ---- token-axis tiling --------------------------------------------------
    tile_s = max(_SUBLANE, min(tile_s, _round_up(S, _SUBLANE)))
    tile_s = _round_up(tile_s, _SUBLANE)
    # Keep the per-step pe/out double-buffer footprint inside budget so a
    # v6e-tuned tile also fits v7x's 64 MiB VMEM.
    while tile_s > _SUBLANE and 16 * tile_s * Dp > _TILE_BUFFERS_BUDGET_BYTES:
        tile_s //= 2
    tile_s = _round_up(tile_s, _SUBLANE)
    S_pad = _round_up(S, tile_s)
    n_s_tiles = S_pad // tile_s

    # ---- inputs --------------------------------------------------------------
    # Flattened ids in SMEM (scalar prefetch). Padded ids gather row 0; those
    # rows are sliced off below.
    # TODO(synk): for very long B*S (>~100K tokens) switch ids to a per-step
    # SMEM-tiled BlockSpec to avoid whole-array SMEM residency.
    ids = jnp.zeros((B, S_pad), jnp.int32).at[:, :S].set(x.astype(jnp.int32))
    ids = ids.reshape(B * S_pad)

    # PE: one (S_pad, Dp) slab tiled by the grid (no (B*S, Dp) materialization).
    pe_s = pe_p[:S]
    if S_pad != S:
        pe_s = jnp.pad(pe_s, ((0, S_pad - S), (0, 0)))

    table_bytes = V * Dp * jnp.dtype(table_p.dtype).itemsize
    resident = (not force_hbm_gather) and table_bytes <= _RESIDENT_TABLE_MAX_BYTES

    pe_spec = pl.BlockSpec((tile_s, Dp), lambda b, j, ids: (j, 0))
    out_spec = pl.BlockSpec((None, tile_s, Dp), lambda b, j, ids: (b, j, 0))

    if resident:
        kernel = _make_resident_kernel(scale, tile_s, unroll=min(8, tile_s))
        table_spec = pl.BlockSpec((V, Dp), lambda b, j, ids: (0, 0))  # VMEM-resident
        scratch_shapes = []
        resident_bytes = table_bytes
    else:
        depth = min(dma_depth, tile_s)
        kernel = _make_hbm_gather_kernel(scale, tile_s, depth)
        table_spec = pl.BlockSpec(memory_space=pl.ANY)                # stays in HBM
        scratch_shapes = [pltpu.SemaphoreType.DMA((depth,))]
        resident_bytes = 0

    # Explicit scoped-VMEM limit from the per-step footprint (2x pe + 2x out
    # double buffers + resident table) with headroom, capped for v7x.
    footprint = 2 * resident_bytes + 16 * tile_s * Dp + (4 << 20)
    vmem_limit = int(min(max(footprint, 16 << 20), _VMEM_LIMIT_CAP_BYTES))

    out = pl.pallas_call(
        kernel,
        out_shape=jax.ShapeDtypeStruct((B, S_pad, Dp), table_p.dtype),
        grid_spec=pltpu.PrefetchScalarGridSpec(
            num_scalar_prefetch=1,
            grid=(B, n_s_tiles),
            in_specs=[table_spec, pe_spec],
            out_specs=out_spec,
            scratch_shapes=scratch_shapes,
        ),
        compiler_params=pltpu.CompilerParams(
            dimension_semantics=("parallel", "parallel"),
            vmem_limit_bytes=vmem_limit,
        ),
    )(ids, table_p, pe_s)

    if S_pad != S or Dp != d_model:
        out = out[:, :S, :d_model]
    return out


def _sinusoidal_pe(max_len, d_model):
    position = jnp.arange(max_len, dtype=jnp.float32)[:, None]
    div_term = jnp.exp(jnp.arange(0, d_model, 2, dtype=jnp.float32)
                       * -(jnp.log(jnp.float32(10000.0)) / d_model))
    angles = position * div_term
    pe = jnp.zeros((max_len, d_model), jnp.float32)
    pe = pe.at[:, 0::2].set(jnp.sin(angles))
    pe = pe.at[:, 1::2].set(jnp.cos(angles))
    return pe


if __name__ == "__main__":
    vocab_size = 64
    d_model = 128          # lane-aligned: no feature padding, no post-slice copy
    max_len = 512
    B, S = 2, 8

    key = jax.random.PRNGKey(0)
    k_table, k_ids = jax.random.split(key)

    # nn.Embedding default init ~ N(0, 1)
    table = jax.random.normal(k_table, (vocab_size, d_model), dtype=jnp.float32)
    x = jax.random.randint(k_ids, (B, S), 0, vocab_size, dtype=jnp.int32)
    pe = _sinusoidal_pe(max_len, d_model)

    params = make_transformer_embedding_params(table, pe, d_model)

    # TODO(synk): nn.Dropout(p=0.1) is identity in eval mode; training-mode
    # stochastic dropout (pltpu.prng_*) is not implemented here.
    ref = jnp.take(table, x, axis=0) * (d_model ** 0.5) + pe[:S][None]

    # Fast path: VMEM-resident table gather.
    out = jax.block_until_ready(transformer_embedding_forward(params, x))
    assert out.shape == (B, S, d_model)
    assert jnp.allclose(out, ref, atol=1e-5, rtol=1e-5)

    # Fallback path: HBM row-DMA gather (exercised explicitly so both paths
    # compile and run).
    out_hbm = jax.block_until_ready(
        transformer_embedding_forward(params, x, force_hbm_gather=True))
    assert jnp.allclose(out_hbm, ref, atol=1e-5, rtol=1e-5)

    print("KERNEL_OK")
</pallas_src>

<mosaic_0001>
module attributes {stable_mosaic.version = 11 : i64} {
  func.func @kernel(%arg0: i32, %arg1: i32, %arg2: memref<16xi32, #tpu.memory_space<smem>>, %arg3: memref<64x128xf32, #tpu.memory_space<vmem>>, %arg4: memref<8x128xf32, #tpu.memory_space<vmem>>, %arg5: memref<1x8x128xf32, #tpu.memory_space<vmem>>) attributes {dimension_semantics = [#tpu.dimension_semantics<parallel>, #tpu.dimension_semantics<parallel>], iteration_bounds = array<i64: 2, 1>, scalar_prefetch = 1 : i64, scratch_operands = 0 : i64, tpu.core_type = #tpu.core_type<tc>, window_params = [{pipeline_mode = #tpu.pipeline_mode<synchronous>, transform_indices = @transform_0, window_bounds = array<i64: 64, 128>}, {transform_indices = @transform_1, window_bounds = array<i64: 8, 128>}, {transform_indices = @transform_2, window_bounds = array<i64: 1, 8, 128>}]} {
    %c1_i32 = arith.constant 1 : i32
    %0 = arith.muli %arg0, %c1_i32 : i32
    %1 = arith.addi %0, %arg1 : i32
    %c8_i32 = arith.constant 8 : i32
    %2 = arith.muli %1, %c8_i32 : i32
    %c0_i32 = arith.constant 0 : i32
    %3 = arith.addi %2, %c0_i32 : i32
    %4 = arith.index_cast %3 : i32 to index
    %5 = memref.load %arg2[%4] : memref<16xi32, #tpu.memory_space<smem>>
    %6 = arith.index_cast %5 : i32 to index
    %c0 = arith.constant 0 : index
    %7 = vector.load %arg3[%6, %c0] : memref<64x128xf32, #tpu.memory_space<vmem>>, vector<1x128xf32>
    %c0_0 = arith.constant 0 : index
    %8 = arith.index_cast %c0_i32 : i32 to index
    %c0_1 = arith.constant 0 : index
    %9 = vector.load %arg5[%c0_0, %8, %c0_1] : memref<1x8x128xf32, #tpu.memory_space<vmem>>, vector<1x1x128xf32>
    %10 = vector.shape_cast %9 : vector<1x1x128xf32> to vector<1x128xf32>
    %11 = vector.shape_cast %7 : vector<1x128xf32> to vector<1x1x128xf32>
    tpu.vector_store %arg5[%c0_0, %8, %c0_1], %11 {strides = array<i32>} : memref<1x8x128xf32, #tpu.memory_space<vmem>>, vector<1x1x128xf32>,
    %c1_i32_2 = arith.constant 1 : i32
    %12 = arith.addi %2, %c1_i32_2 : i32
    %13 = arith.index_cast %12 : i32 to index
    %14 = memref.load %arg2[%13] : memref<16xi32, #tpu.memory_space<smem>>
    %15 = arith.index_cast %14 : i32 to index
    %c0_3 = arith.constant 0 : index
    %16 = vector.load %arg3[%15, %c0_3] : memref<64x128xf32, #tpu.memory_space<vmem>>, vector<1x128xf32>
    %c0_4 = arith.constant 0 : index
    %17 = arith.index_cast %c1_i32_2 : i32 to index
    %c0_5 = arith.constant 0 : index
    %18 = vector.load %arg5[%c0_4, %17, %c0_5] : memref<1x8x128xf32, #tpu.memory_space<vmem>>, vector<1x1x128xf32>
    %19 = vector.shape_cast %18 : vector<1x1x128xf32> to vector<1x128xf32>
    %20 = vector.shape_cast %16 : vector<1x128xf32> to vector<1x1x128xf32>
    tpu.vector_store %arg5[%c0_4, %17, %c0_5], %20 {strides = array<i32>} : memref<1x8x128xf32, #tpu.memory_space<vmem>>, vector<1x1x128xf32>,
    %c2_i32 = arith.constant 2 : i32
    %21 = arith.addi %2, %c2_i32 : i32
    %22 = arith.index_cast %21 : i32 to index
    %23 = memref.load %arg2[%22] : memref<16xi32, #tpu.memory_space<smem>>
    %24 = arith.index_cast %23 : i32 to index
    %c0_6 = arith.constant 0 : index
    %25 = vector.load %arg3[%24, %c0_6] : memref<64x128xf32, #tpu.memory_space<vmem>>, vector<1x128xf32>
    %c0_7 = arith.constant 0 : index
    %26 = arith.index_cast %c2_i32 : i32 to index
    %c0_8 = arith.constant 0 : index
    %27 = vector.load %arg5[%c0_7, %26, %c0_8] : memref<1x8x128xf32, #tpu.memory_space<vmem>>, vector<1x1x128xf32>
    %28 = vector.shape_cast %27 : vector<1x1x128xf32> to vector<1x128xf32>
    %29 = vector.shape_cast %25 : vector<1x128xf32> to vector<1x1x128xf32>
    tpu.vector_store %arg5[%c0_7, %26, %c0_8], %29 {strides = array<i32>} : memref<1x8x128xf32, #tpu.memory_space<vmem>>, vector<1x1x128xf32>,
    %c3_i32 = arith.constant 3 : i32
    %30 = arith.addi %2, %c3_i32 : i32
    %31 = arith.index_cast %30 : i32 to index
    %32 = memref.load %arg2[%31] : memref<16xi32, #tpu.memory_space<smem>>
    %33 = arith.index_cast %32 : i32 to index
    %c0_9 = arith.constant 0 : index
    %34 = vector.load %arg3[%33, %c0_9] : memref<64x128xf32, #tpu.memory_space<vmem>>, vector<1x128xf32>
    %c0_10 = arith.constant 0 : index
    %35 = arith.index_cast %c3_i32 : i32 to index
    %c0_11 = arith.constant 0 : index
    %36 = vector.load %arg5[%c0_10, %35, %c0_11] : memref<1x8x128xf32, #tpu.memory_space<vmem>>, vector<1x1x128xf32>
    %37 = vector.shape_cast %36 : vector<1x1x128xf32> to vector<1x128xf32>
    %38 = vector.shape_cast %34 : vector<1x128xf32> to vector<1x1x128xf32>
    tpu.vector_store %arg5[%c0_10, %35, %c0_11], %38 {strides = array<i32>} : memref<1x8x128xf32, #tpu.memory_space<vmem>>, vector<1x1x128xf32>,
    %c4_i32 = arith.constant 4 : i32
    %39 = arith.addi %2, %c4_i32 : i32
    %40 = arith.index_cast %39 : i32 to index
    %41 = memref.load %arg2[%40] : memref<16xi32, #tpu.memory_space<smem>>
    %42 = arith.index_cast %41 : i32 to index
    %c0_12 = arith.constant 0 : index
    %43 = vector.load %arg3[%42, %c0_12] : memref<64x128xf32, #tpu.memory_space<vmem>>, vector<1x128xf32>
    %c0_13 = arith.constant 0 : index
    %44 = arith.index_cast %c4_i32 : i32 to index
    %c0_14 = arith.constant 0 : index
    %45 = vector.load %arg5[%c0_13, %44, %c0_14] : memref<1x8x128xf32, #tpu.memory_space<vmem>>, vector<1x1x128xf32>
    %46 = vector.shape_cast %45 : vector<1x1x128xf32> to vector<1x128xf32>
    %47 = vector.shape_cast %43 : vector<1x128xf32> to vector<1x1x128xf32>
    tpu.vector_store %arg5[%c0_13, %44, %c0_14], %47 {strides = array<i32>} : memref<1x8x128xf32, #tpu.memory_space<vmem>>, vector<1x1x128xf32>,
    %c5_i32 = arith.constant 5 : i32
    %48 = arith.addi %2, %c5_i32 : i32
    %49 = arith.index_cast %48 : i32 to index
    %50 = memref.load %arg2[%49] : memref<16xi32, #tpu.memory_space<smem>>
    %51 = arith.index_cast %50 : i32 to index
    %c0_15 = arith.constant 0 : index
    %52 = vector.load %arg3[%51, %c0_15] : memref<64x128xf32, #tpu.memory_space<vmem>>, vector<1x128xf32>
    %c0_16 = arith.constant 0 : index
    %53 = arith.index_cast %c5_i32 : i32 to index
    %c0_17 = arith.constant 0 : index
    %54 = vector.load %arg5[%c0_16, %53, %c0_17] : memref<1x8x128xf32, #tpu.memory_space<vmem>>, vector<1x1x128xf32>
    %55 = vector.shape_cast %54 : vector<1x1x128xf32> to vector<1x128xf32>
    %56 = vector.shape_cast %52 : vector<1x128xf32> to vector<1x1x128xf32>
    tpu.vector_store %arg5[%c0_16, %53, %c0_17], %56 {strides = array<i32>} : memref<1x8x128xf32, #tpu.memory_space<vmem>>, vector<1x1x128xf32>,
    %c6_i32 = arith.constant 6 : i32
    %57 = arith.addi %2, %c6_i32 : i32
    %58 = arith.index_cast %57 : i32 to index
    %59 = memref.load %arg2[%58] : memref<16xi32, #tpu.memory_space<smem>>
    %60 = arith.index_cast %59 : i32 to index
    %c0_18 = arith.constant 0 : index
    %61 = vector.load %arg3[%60, %c0_18] : memref<64x128xf32, #tpu.memory_space<vmem>>, vector<1x128xf32>
    %c0_19 = arith.constant 0 : index
    %62 = arith.index_cast %c6_i32 : i32 to index
    %c0_20 = arith.constant 0 : index
    %63 = vector.load %arg5[%c0_19, %62, %c0_20] : memref<1x8x128xf32, #tpu.memory_space<vmem>>, vector<1x1x128xf32>
    %64 = vector.shape_cast %63 : vector<1x1x128xf32> to vector<1x128xf32>
    %65 = vector.shape_cast %61 : vector<1x128xf32> to vector<1x1x128xf32>
    tpu.vector_store %arg5[%c0_19, %62, %c0_20], %65 {strides = array<i32>} : memref<1x8x128xf32, #tpu.memory_space<vmem>>, vector<1x1x128xf32>,
    %c7_i32 = arith.constant 7 : i32
    %66 = arith.addi %2, %c7_i32 : i32
    %67 = arith.index_cast %66 : i32 to index
    %68 = memref.load %arg2[%67] : memref<16xi32, #tpu.memory_space<smem>>
    %69 = arith.index_cast %68 : i32 to index
    %c0_21 = arith.constant 0 : index
    %70 = vector.load %arg3[%69, %c0_21] : memref<64x128xf32, #tpu.memory_space<vmem>>, vector<1x128xf32>
    %c0_22 = arith.constant 0 : index
    %71 = arith.index_cast %c7_i32 : i32 to index
    %c0_23 = arith.constant 0 : index
    %72 = vector.load %arg5[%c0_22, %71, %c0_23] : memref<1x8x128xf32, #tpu.memory_space<vmem>>, vector<1x1x128xf32>
    %73 = vector.shape_cast %72 : vector<1x1x128xf32> to vector<1x128xf32>
    %74 = vector.shape_cast %70 : vector<1x128xf32> to vector<1x1x128xf32>
    tpu.vector_store %arg5[%c0_22, %71, %c0_23], %74 {strides = array<i32>} : memref<1x8x128xf32, #tpu.memory_space<vmem>>, vector<1x1x128xf32>,
    %c8_i32_24 = arith.constant 8 : i32
    %c0_25 = arith.constant 0 : index
    %c0_26 = arith.constant 0 : index
    %c0_27 = arith.constant 0 : index
    %75 = vector.load %arg5[%c0_25, %c0_26, %c0_27] : memref<1x8x128xf32, #tpu.memory_space<vmem>>, vector<1x8x128xf32>
    %76 = vector.shape_cast %75 : vector<1x8x128xf32> to vector<8x128xf32>
    %cst = arith.constant 11.3137083 : f32
    %77 = vector.broadcast %cst : f32 to vector<8x128xf32>
    %78 = arith.mulf %76, %77 : vector<8x128xf32>
    %c0_28 = arith.constant 0 : index
    %c0_29 = arith.constant 0 : index
    %79 = vector.load %arg4[%c0_28, %c0_29] : memref<8x128xf32, #tpu.memory_space<vmem>>, vector<8x128xf32>
    %80 = arith.addf %78, %79 : vector<8x128xf32>
    %c0_30 = arith.constant 0 : index
    %c0_31 = arith.constant 0 : index
    %c0_32 = arith.constant 0 : index
    %81 = vector.load %arg5[%c0_30, %c0_31, %c0_32] : memref<1x8x128xf32, #tpu.memory_space<vmem>>, vector<1x8x128xf32>
    %82 = vector.shape_cast %81 : vector<1x8x128xf32> to vector<8x128xf32>
    %83 = vector.shape_cast %80 : vector<8x128xf32> to vector<1x8x128xf32>
    tpu.vector_store %arg5[%c0_30, %c0_31, %c0_32], %83 {strides = array<i32>} : memref<1x8x128xf32, #tpu.memory_space<vmem>>, vector<1x8x128xf32>,
    return
  }
  func.func @transform_0(%arg0: i32, %arg1: i32, %arg2: memref<16xi32, #tpu.memory_space<smem>>) -> (i32, i32) {
    %c0_i32 = arith.constant 0 : i32
    %c0_i32_0 = arith.constant 0 : i32
    %c0_i32_1 = arith.constant 0 : i32
    return %c0_i32, %c0_i32_0 : i32, i32
  }
  func.func @transform_1(%arg0: i32, %arg1: i32, %arg2: memref<16xi32, #tpu.memory_space<smem>>) -> (i32, i32) {
    %c0_i32 = arith.constant 0 : i32
    %c0_i32_0 = arith.constant 0 : i32
    return %arg1, %c0_i32 : i32, i32
  }
  func.func @transform_2(%arg0: i32, %arg1: i32, %arg2: memref<16xi32, #tpu.memory_space<smem>>) -> (i32, i32, i32) {
    %c0_i32 = arith.constant 0 : i32
    %c0_i32_0 = arith.constant 0 : i32
    return %arg0, %arg1, %c0_i32 : i32, i32, i32
  }
}

</mosaic_0001>

<bundles_post_ra>
// kernel: tpu_custom_call.1
= control target key start
LH: loop header
LB: loop body
LE: loop exit
PB: predicated region body
PF: predicated region fallthrough
CT: control target
= control target key end

     0   :  { %s812_s0 = inlined_call_operand.hbm [shape: s32[16], index: 0, kind: input, shape index: {}]   ;;  %s813_s1 = inlined_call_operand.hbm [shape: f32[64,128], index: 1, kind: input, shape index: {}]   ;;  %s814_s2 = inlined_call_operand.hbm [shape: f32[8,128], index: 2, kind: input, shape index: {}]   ;;  %s815_s3 = inlined_call_operand.hbm [shape: f32[2,8,128], index: 3, kind: output, shape index: {}]  }
   0x1   :  { %s418_s14 = scalar_lea.hbm %s812_s0, 16 }
   0x2   :  { %p419_p0 = scmp.ne.s32.totalorder %s812_s0, %s418_s14  ;;  %p422_p1 = scmp.lt.u32.totalorder %s418_s14, %s812_s0 }
   0x4   :  { %p424_p2 = pnand %p422_p1, %p419_p0 }
   0x6   :  { %427 = shalt.err (!%p424_p2)  }
   0x7   :  { %s574_s19 = smov [#allocation3]  }
   0x8   :  { %9 = dma.hbm_to_smem %s812_s0, 16, %s574_s19, [#allocation2] }
   0x9   :  { %536 = dma.done.wait [#allocation2], 16 }
   0xa   :  { %537 = vsyncadd [#allocation2], 4294967280 }
   0xb   :  { %11 = sfence }
   0xc   :  { %12 = vsyncpa [#allocation5], 0 }
   0xd   :  { %13 = vsyncpa [#allocation8], 0 }
   0xe   :  { %14 = vsyncpa [#allocation6], 0 }
   0xf   :  { %16 = vsyncpa [#allocation6 + $0x1], 0  ;;  %s612_s22 = smov 0   ;;  %s614_s23 = smov 0  }
  0x10   :  { %s616_s24 = smov 0   ;;  %s618_s25 = smov 0  }
  0x11   :  { %s620_s26 = smov 0   ;;  %s622_s27 = smov 0  }
  0x12 LB: > { %s325_s0 = sadd.s32 4294967295, %s572_s27   ;;  %s326_s28 = sadd.s32 4294967294, %s572_s27   ;;  %s572_s27 = sphi %s622_s27, %s22_s27   ;;  %s568_s26 = sphi %s620_s26, %s833_s26   ;;  %s564_s25 = sphi %s618_s25, %s832_s25   ;;  %s560_s24 = sphi %s616_s24, %s831_s24   ;;  %s556_s23 = sphi %s614_s23, %s830_s23   ;;  %s552_s22 = sphi %s612_s22, %s829_s22  }
  0x13   : > { %s34_s29 = sadd.s32 1, %s568_s26  ;;  %s90_s30 = sadd.s32 1, %s560_s24 }
  0x14   : > { %p36_p3 = scmp.ge.s32.totalorder %s34_s29, 2  ;;  %p100_p4 = scmp.ne.s32.totalorder %s560_s24, %s556_s23 }
  0x15   : > { %p101_p5 = scmp.eq.s32.totalorder %s325_s0, 1  ;;  %p106_p6 = scmp.ne.s32.totalorder %s556_s23, %s552_s22 }
  0x16   : > { %s835_s29 = smov (%p36_p3, %s34_s29), 0  ;;  %p107_p8 = scmp.eq.s32.totalorder %s326_s28, 1 }
  0x17   : > { %p652_p7 = por %p101_p5, %p100_p4  ;;  %s85_s5 = ssub.s32 %s568_s26, %s835_s29 }
  0x18   : > { %p327_p9 = scmp.ge.s32.totalorder %s572_s27, 1  ;;  %p88_p10 = scmp.eq.s32.totalorder %s85_s5, 0 }
  0x19   : > { %s820_s4 = scalar_select %p652_p7, 1, 0 }
  0x1a   : > { %p659_p11 = por %p107_p8, %p106_p6  ;;  %p114_p12 = scmp.lt.s32.totalorder %s572_s27, 3 }
  0x1b   : > { %s665_s7 = scalar_select %p88_p10, %s560_s24, %s90_s30  }
  0x1c   : > { %s821_s6 = scalar_select %p659_p11, 1, 0 }
  0x1d   : > { %p667_p13 = pnand %p327_p9, %p114_p12  ;;  %p671_p0 = scmp.eq.s32.totalorder %s325_s0, 0 }
  0x1e   : > { %s575_s10 = smov [#allocation4]   ;;  %s576_s13 = smov [#allocation7]  }
  0x1f   : > { %s822_s8 = scalar_select %p667_p13, 1, 0 }
  0x20   : > { %s823_s9 = scalar_select %p671_p0, 1, 0 }
  0x21   : > { %p349_p1 = pneg %p667_p13  ;;  %s126_s11 = sshll.u32 %s575_s10, 4  ;;  %s127_s11 = int_to_ptr.vmem [resolvable:$true] %s126_s11 }
  0x22   : > { %s142_s14 = sshll.u32 %s576_s13, 4  ;;  %s428_s17 = scalar_lea.hbm %s813_s1, 1024  ;;  %s683_s14 = int_to_ptr.vmem [resolvable:$true] %s142_s14 }
  0x23   : > { %p679_p2 = pnand %p671_p0, %p349_p1  ;;  %p429_p3 = scmp.ne.s32.totalorder %s813_s1, %s428_s17 }
  0x24   : > { %p435_p8 = scmp.lt.u32.totalorder %s428_s17, %s813_s1 }
  0x25   : > { %p430_p4 = pneg %p679_p2 }
  0x27   : > { %p431_p5 = pnand %p430_p4, %p429_p3 }
  0x29   : > { %p432_p6 = pneg %p431_p5 }
  0x2b   : > { %p437_p9 = pnand %p435_p8, %p432_p6 }
  0x2d   : > { %440 = shalt.err (!%p437_p9)
}
  0x2e   : > { %s441_s0 = scalar_lea.vmem %s127_s11, 1024  ;;  %p449_p11 = scmp.lt.s32.totalorder %s127_s11, %s127_s11 }
  0x2f   : > { %p442_p10 = scmp.ne.s32.totalorder %s127_s11, %s441_s0  ;;  %p450_p7 = scmp.lt.s32.totalorder %s441_s0, %s441_s0 }
  0x31   : > { %p444_p12 = pnand %p442_p10, %p430_p4  ;;  %p451_p0 = por %p450_p7, %p449_p11 }
  0x33   : > { %p445_p1 = pneg %p444_p12 }
  0x35   : > { %p452_p13 = pnand %p451_p0, %p445_p1 }
  0x37   : > { %455 = shalt.err (!%p452_p13)
}
  0x38   : > { %s577_s28 = smov 128   ;;  %s578_s30 = smov 8  }
  0x39   : > { %352 = dma.hbm_to_vmem [thread:$0]  (!%p679_p2), %s813_s1, 1024, %s127_s11, [#allocation5], %s577_s28, %s577_s28, %s578_s30  }
  0x3a   : > { %s456_s16 = scalar_lea.hbm %s814_s2, 128 }
  0x3b   : > { %p457_p3 = scmp.ne.s32.totalorder %s814_s2, %s456_s16  ;;  %p463_p13 = scmp.lt.u32.totalorder %s456_s16, %s814_s2 }
  0x3d   : > { %p459_p7 = pnand %p457_p3, %p430_p4 }
  0x3f   : > { %p460_p11 = pneg %p459_p7 }
  0x41   : > { %p465_p0 = pnand %p463_p13, %p460_p11 }
  0x43   : > { %468 = shalt.err (!%p465_p0)
}
  0x44   : > { %s469_s11 = scalar_lea.vmem %s683_s14, 128  ;;  %p477_p9 = scmp.lt.s32.totalorder %s683_s14, %s683_s14 }
  0x45   : > { %p470_p5 = scmp.ne.s32.totalorder %s683_s14, %s469_s11  ;;  %p478_p10 = scmp.lt.s32.totalorder %s469_s11, %s469_s11 }
  0x47   : > { %p472_p6 = pnand %p470_p5, %p430_p4  ;;  %p479_p12 = por %p478_p10, %p477_p9 }
  0x49   : > { %p473_p8 = pneg %p472_p6 }
  0x4b   : > { %p480_p1 = pnand %p479_p12, %p473_p8 }
  0x4d   : > { %483 = shalt.err (!%p480_p1)
}
  0x4e   : > { %355 = dma.hbm_to_vmem [thread:$0]  (!%p679_p2), %s814_s2, 128, %s683_s14, [#allocation8]  }
  0x4f   : > { %p825_p3 = scmp.ne.s32.totalorder %s822_s8, 0 }
  0x50   : > { %p826_p7 = scmp.ne.s32.totalorder (!%p825_p3), %s823_s9, 0 }
  0x51   : > { %155 = sbr.rel (%p825_p3) target bundleno = 135 (0x87), region = 28 }
  0x58   : > { %539 = dma.done.wait (%p826_p7), [#allocation5], 1024  }
  0x59   : > { %541 = vsyncadd (%p826_p7), [#allocation5], 4294966272 }
  0x5a   : > { %543 = dma.done.wait (%p826_p7), [#allocation8], 128  }
  0x5b   : > { %545 = vsyncadd (%p826_p7), [#allocation8], 4294967168  ;;  %s173_s12 = sand.u32 1, %s556_s23   ;;  %s334_s14 = sshll.u32 %s564_s25, 3  ;;  %v219_v9 = vld [vmem:[#allocation7] sm:$0xff] }
  0x5c   : > { %s333_s8 = sshll.u32 %s173_s12, 3  ;;  %s178_s28 = sld [smem:[#allocation3 + %s334_s14]] }
  0x5d   : > { %s182_s30 = sadd.s32 1, %s334_s14  ;;  %s187_s10 = sadd.s32 2, %s334_s14 }
  0x5e   : > { %s183_s5 = sld [smem:[#allocation3 + %s182_s30]]  ;;  %s192_s15 = sadd.s32 3, %s334_s14 }
  0x5f   : > { %s188_s13 = sld [smem:[#allocation3 + %s187_s10]]  ;;  %s197_s17 = sadd.s32 4, %s334_s14 }
  0x60   : > { %s193_s16 = sld [smem:[#allocation3 + %s192_s15]]  ;;  %s202_s19 = sadd.s32 5, %s334_s14 }
  0x61   : > { %s198_s18 = sld [smem:[#allocation3 + %s197_s17]]  ;;  %s207_s11 = sadd.s32 6, %s334_s14 }
  0x62   : > { %s203_s20 = sld [smem:[#allocation3 + %s202_s19]]  ;;  %s179_s9 = scalar_lea.vmem [#allocation4], %s178_s28 }
  0x63   : > { %v180_v0 = vld [vmem:[%s179_s9] sm:$0x1]  ;;  %s212_s21 = sadd.s32 7, %s334_s14  ;;  %s746_s0 = scalar_lea.vmem [#allocation9], %s333_s8 }
  0x64   : > { %181 = vst [vmem:[%s746_s0] sm:$0x1] %v180_v0  ;;  %s208_s30 = sld [smem:[#allocation3 + %s207_s11]]  ;;  %s184_s10 = scalar_lea.vmem [#allocation4], %s183_s5 }
  0x65   : > { %v185_v1 = vld [vmem:[%s184_s10] sm:$0x1]  ;;  %s213_s15 = sld [smem:[#allocation3 + %s212_s21]]  ;;  %s189_s17 = scalar_lea.vmem [#allocation4], %s188_s13 }
  0x66   : > { %186 = vst [vmem:[%s746_s0 + $0x1] sm:$0x1] %v185_v1  ;;  %v190_v2 = vld [vmem:[%s189_s17] sm:$0x1]  ;;  %s194_s14 = scalar_lea.vmem [#allocation4], %s193_s16  ;;  %s336_s16 = sshll.u32 %s564_s25, 7 }
  0x67   : > { %191 = vst [vmem:[%s746_s0 + $0x2] sm:$0x1] %v190_v2  ;;  %v195_v3 = vld [vmem:[%s194_s14] sm:$0x1]  ;;  %s199_s8 = scalar_lea.vmem [#allocation4], %s198_s18  ;;  %s237_s19 = sshll.u32 %s746_s0, 4  ;;  %s764_s19 = int_to_ptr.vmem [resolvable:$true] %s237_s19 }
  0x68   : > { %196 = vst [vmem:[%s746_s0 + $0x3] sm:$0x1] %v195_v3  ;;  %v200_v4 = vld [vmem:[%s199_s8] sm:$0x1]  ;;  %s204_s28 = scalar_lea.vmem [#allocation4], %s203_s20  ;;  %s762_s20 = scalar_lea.hbm %s815_s3, %s336_s16 }
  0x69   : > { %201 = vst [vmem:[%s746_s0 + $0x4] sm:$0x1] %v200_v4  ;;  %v205_v5 = vld [vmem:[%s204_s28] sm:$0x1]  ;;  %s223_s11 = scalar_lea.sflag [#allocation6], %s173_s12  ;;  %s484_s21 = scalar_lea.vmem %s764_s19, 128 }
  0x6a   : > { %206 = vst [vmem:[%s746_s0 + $0x5] sm:$0x1] %v205_v5  ;;  %s209_s5 = scalar_lea.vmem [#allocation4], %s208_s30  ;;  %p485_p2 = scmp.ne.s32.totalorder %s764_s19, %s484_s21 }
  0x6b   : > { %v210_v6 = vld [vmem:[%s209_s5] sm:$0x1]  ;;  %s214_s13 = scalar_lea.vmem [#allocation4], %s213_s15  ;;  %p827_p4 = scmp.ne.s32.totalorder %s820_s4, 0 }
  0x6c   : > { %211 = vst [vmem:[%s746_s0 + $0x6] sm:$0x1] %v210_v6  ;;  %v215_v7 = vld [vmem:[%s214_s13] sm:$0x1]  ;;  %s579_s25 = smov [#allocation9]  }
  0x6d   : > { %216 = vst [vmem:[%s746_s0 + $0x7] sm:$0x1] %v215_v7  ;;  %p486_p11 = pnand %p485_p2, %p827_p4  ;;  %s488_s30 = sshll.u32 %s579_s25, 4  ;;  %s489_s30 = int_to_ptr.vmem [resolvable:$false] %s488_s30 }
  0x6e   : > { %s490_s10 = scalar_lea.vmem %s489_s30, 256  ;;  %p491_p0 = scmp.lt.s32.totalorder %s764_s19, %s489_s30 }
  0x6f   : > { %p487_p13 = pneg %p486_p11  ;;  %p492_p5 = scmp.lt.s32.totalorder %s490_s10, %s484_s21 }
  0x71   : > { %p493_p6 = por %p492_p5, %p491_p0 }
  0x73   : > { %p494_p8 = pnand %p493_p6, %p487_p13 }
  0x74   : > { %v217_v8 = vld [vmem:[%s746_s0] sm:$0xff] }
  0x75   : > { %v218_v10 = vmul.f32 11.313708, %v217_v8 }
  0x77   : > { %v220_v11 = vadd.f32 %v219_v9, %v218_v10 }
  0x79   : > { %221 = vst [vmem:[%s746_s0] sm:$0xff] %v220_v11 }
  0x7a   : > { %497 = shalt.err (!%p494_p8)
}
  0x7b   : > { %s498_s12 = scalar_lea.hbm %s762_s20, 128  ;;  %s502_s17 = scalar_lea.hbm %s815_s3, 256 }
  0x7c   : > { %p499_p9 = scmp.ne.s32.totalorder %s762_s20, %s498_s12  ;;  %p503_p1 = scmp.lt.u32.totalorder %s762_s20, %s815_s3 }
  0x7d   : > { %p504_p3 = scmp.lt.u32.totalorder %s502_s17, %s498_s12  ;;  %p506_p2 = scmp.lt.u32.totalorder %s498_s12, %s762_s20 }
  0x7e   : > { %p500_p10 = pnand %p499_p9, %p827_p4 }
  0x7f   : > { %p505_p7 = por %p504_p3, %p503_p1 }
  0x80   : > { %p501_p12 = pneg %p500_p10 }
  0x81   : > { %p507_p11 = por %p506_p2, %p505_p7 }
  0x83   : > { %p508_p13 = pnand %p507_p11, %p501_p12 }
  0x85   : > { %511 = shalt.err (!%p508_p13)
}
  0x86   : > { %347 = dma.vmem_to_hbm [thread:$0]  (%p827_p4), %s764_s19, 128, %s762_s20, %s223_s11  }
  0x87 PF: > { %p364_p0 = scmp.ge.s32.totalorder %s572_s27, 2  ;;  %s249_s28 = sand.u32 1, %s552_s22  }
  0x88   : > { %p828_p5 = scmp.ne.s32.totalorder %s821_s6, 0  ;;  %s250_s5 = scalar_lea.sflag [#allocation6], %s249_s28 }
  0x8a   : > { %p357_p6 = pnand %p364_p0, %p828_p5 }
  0x8c   : > { %547 = dma.done.wait (!%p357_p6), %s250_s5, 128  }
  0x8d   : > { %549 = vsyncadd (!%p357_p6), %s250_s5, 4294967168  ;;  %s22_s27 = sadd.s32 1, %s572_s27   ;;  %s829_s22 = smov %s556_s23 }
  0x8e   : > { %p19_p8 = scmp.ge.s32.totalorder %s22_s27, 4   ;;  %s830_s23 = smov %s560_s24 }
  0x8f   : > { %s831_s24 = smov %s665_s7  ;;  %s832_s25 = smov %s568_s26 }
  0x90   : > { %s833_s26 = smov %s835_s29  ;;  %21 = sbr.rel (!%p19_p8) target bundleno = 18 (0x12), region = 78 }
  0x97   :  { %255 = vsyncpa [#allocation5], 1 }
  0x98   :  { %257 = vsyncpa [#allocation5 + $0x1], 1 }
  0x99   :  { %258 = vsyncpa [#allocation8], 1 }
  0x9a   :  { %259 = vsyncpa [#allocation6], 1 }
  0x9b   :  { %261 = vsyncpa [#allocation6 + $0x1], 1 }

</bundles_post_ra>
